<compile_context>
chip_gen: v5e
topology: v5e:2x2
jax: 0.10.0
libtpu: 0.0.40
codegen_flags: <defaults>
</compile_context>

<pallas_src>
import functools

import jax
import jax.numpy as jnp
from jax.experimental import pallas as pl
from jax.experimental.pallas import tpu as pltpu


def _round_up(n, m):
    return ((n + m - 1) // m) * m


def gaussian_kernel(x_ref, w1_ref, b1_ref, w2_ref, b2_ref, wh_ref, bh_ref,
                    out_ref, *, out_pad):
    x = x_ref[...]                                              # (TB, in_pad) bf16
    # layer1 + ReLU (f32 accumulate, bf16 operands for next MXU pass)
    h1 = jnp.dot(x, w1_ref[...], preferred_element_type=jnp.float32) + b1_ref[...]
    h1 = jnp.maximum(h1, 0.0).astype(x.dtype)
    # layer2 + ReLU
    h2 = jnp.dot(h1, w2_ref[...], preferred_element_type=jnp.float32) + b2_ref[...]
    h2 = jnp.maximum(h2, 0.0).astype(x.dtype)
    # fused heads: one dot produces [mean | var] packed along lanes
    heads = jnp.dot(h2, wh_ref[...], preferred_element_type=jnp.float32) + bh_ref[...]
    # ReLU only the var half via a lane-id mask (no slicing/concat -> no layout moves)
    col = jax.lax.broadcasted_iota(jnp.int32, heads.shape, 1)
    out = jnp.where(col >= out_pad, jnp.maximum(heads, 0.0), heads)
    out_ref[...] = out.astype(out_ref.dtype)                    # (TB, 2*out_pad) f32


def init_params(key, input_size, hidden_size, output_size):
    """Deterministic synthetic params; stored as (in, out) for x @ W."""
    ks = jax.random.split(key, 8)

    def lin(kw, kb, fan_in, fan_out):
        bound = 1.0 / jnp.sqrt(fan_in)
        w = jax.random.uniform(kw, (fan_in, fan_out), jnp.float32, -bound, bound)
        b = jax.random.uniform(kb, (1, fan_out), jnp.float32, -bound, bound)
        return w, b

    w1, b1 = lin(ks[0], ks[1], input_size, hidden_size)
    w2, b2 = lin(ks[2], ks[3], hidden_size, hidden_size)
    wm, bm = lin(ks[4], ks[5], hidden_size, output_size)
    wv, bv = lin(ks[6], ks[7], hidden_size, output_size)
    return dict(w1=w1, b1=b1, w2=w2, b2=b2, wm=wm, bm=bm, wv=wv, bv=bv)


def pack_params(params, *, compute_dtype=jnp.bfloat16):
    """One-time setup: pad feature dims to 128 lanes, fuse the two heads into a
    single (hidden_pad, 2*out_pad) weight, and cast weights to the compute dtype.
    Biases stay f32 (they are added to the f32 accumulator)."""
    w1, b1 = params["w1"], params["b1"]
    w2, b2 = params["w2"], params["b2"]
    wm, bm = params["wm"], params["bm"]
    wv, bv = params["wv"], params["bv"]

    in_size, hidden = w1.shape
    out_size = wm.shape[1]
    in_pad = _round_up(in_size, 128)
    hid_pad = _round_up(hidden, 128)
    out_pad = _round_up(out_size, 64)  # packed width 2*out_pad is a multiple of 128

    def pad2(a, rows, cols):
        return jnp.pad(a, ((0, rows - a.shape[0]), (0, cols - a.shape[1])))

    w1p = pad2(w1, in_pad, hid_pad).astype(compute_dtype)
    b1p = pad2(b1, 1, hid_pad).astype(jnp.float32)
    w2p = pad2(w2, hid_pad, hid_pad).astype(compute_dtype)
    b2p = pad2(b2, 1, hid_pad).astype(jnp.float32)
    whp = jnp.concatenate(
        [pad2(wm, hid_pad, out_pad), pad2(wv, hid_pad, out_pad)], axis=1
    ).astype(compute_dtype)
    bhp = jnp.concatenate(
        [pad2(bm, 1, out_pad), pad2(bv, 1, out_pad)], axis=1
    ).astype(jnp.float32)

    return dict(w1=w1p, b1=b1p, w2=w2p, b2=b2p, wh=whp, bh=bhp,
                in_size=in_size, in_pad=in_pad, hid_pad=hid_pad,
                out_size=out_size, out_pad=out_pad)


def gaussian_network(x, packed, *, batch_tile=256):
    """x: (B, input_size) float32. packed: output of pack_params.
    Returns (mean, var), each (B, output_size) float32."""
    in_size, in_pad = packed["in_size"], packed["in_pad"]
    out_size, out_pad = packed["out_size"], packed["out_pad"]
    compute_dtype = packed["w1"].dtype

    B = x.shape[0]
    # Batch tile: multiple of 8 sublanes, capped by the requested tile; pad B up.
    tb = min(batch_tile, _round_up(B, 8))
    B_pad = _round_up(B, tb)
    x_p = jnp.pad(x, ((0, B_pad - B), (0, in_pad - in_size))).astype(compute_dtype)

    width = 2 * out_pad  # lane-dense packed output: [mean_pad | var_pad]

    def const_spec(shape):
        return pl.BlockSpec(shape, lambda i: (0,) * len(shape))

    kernel = functools.partial(gaussian_kernel, out_pad=out_pad)

    packed_out = pl.pallas_call(
        kernel,
        out_shape=jax.ShapeDtypeStruct((B_pad, width), jnp.float32),
        grid=(B_pad // tb,),
        in_specs=[
            pl.BlockSpec((tb, in_pad), lambda i: (i, 0)),       # x: tiled along batch
            const_spec(packed["w1"].shape), const_spec(packed["b1"].shape),
            const_spec(packed["w2"].shape), const_spec(packed["b2"].shape),
            const_spec(packed["wh"].shape), const_spec(packed["bh"].shape),
        ],
        out_specs=pl.BlockSpec((tb, width), lambda i: (i, 0)),
        compiler_params=pltpu.CompilerParams(
            dimension_semantics=("parallel",)),                 # megacore-shardable on v7x
    )(x_p, packed["w1"], packed["b1"], packed["w2"], packed["b2"],
      packed["wh"], packed["bh"])

    mean = packed_out[:B, :out_size]
    var = packed_out[:B, out_pad:out_pad + out_size]
    return mean, var


def reference(x, p):
    """Pure-f32 JAX reference of the PyTorch forward."""
    h1 = jnp.maximum(x @ p["w1"] + p["b1"], 0.0)
    h2 = jnp.maximum(h1 @ p["w2"] + p["b2"], 0.0)
    mean = h2 @ p["wm"] + p["bm"]
    var = jnp.maximum(h2 @ p["wv"] + p["bv"], 0.0)
    return mean, var


if __name__ == "__main__":
    key = jax.random.PRNGKey(0)
    k_x, k_p = jax.random.split(key)

    batch, input_size, hidden_size, output_size = 8, 16, 32, 8
    x = jax.random.normal(k_x, (batch, input_size), dtype=jnp.float32)
    params = init_params(k_p, input_size, hidden_size, output_size)
    packed = pack_params(params)

    mean, var = gaussian_network(x, packed)
    jax.block_until_ready((mean, var))

    mean_ref, var_ref = reference(x, params)
    assert mean.shape == (batch, output_size) and var.shape == (batch, output_size)
    # bf16 operands / f32 accumulation vs pure-f32 reference -> loose tolerance.
    assert jnp.allclose(mean, mean_ref, atol=5e-2, rtol=5e-2), "mean mismatch"
    assert jnp.allclose(var, var_ref, atol=5e-2, rtol=5e-2), "var mismatch"

    print("KERNEL_OK")
</pallas_src>

<mosaic_0001>
module attributes {stable_mosaic.version = 11 : i64} {
  func.func @gaussian_kernel(%arg0: i32, %arg1: memref<8x128xbf16, #tpu.memory_space<vmem>>, %arg2: memref<128x128xbf16, #tpu.memory_space<vmem>>, %arg3: memref<1x128xf32, #tpu.memory_space<vmem>>, %arg4: memref<128x128xbf16, #tpu.memory_space<vmem>>, %arg5: memref<1x128xf32, #tpu.memory_space<vmem>>, %arg6: memref<128x128xbf16, #tpu.memory_space<vmem>>, %arg7: memref<1x128xf32, #tpu.memory_space<vmem>>, %arg8: memref<8x128xf32, #tpu.memory_space<vmem>>) attributes {dimension_semantics = [#tpu.dimension_semantics<parallel>], iteration_bounds = array<i64: 1>, scalar_prefetch = 0 : i64, scratch_operands = 0 : i64, tpu.core_type = #tpu.core_type<tc>, window_params = [{transform_indices = @transform_0, window_bounds = array<i64: 8, 128>}, {pipeline_mode = #tpu.pipeline_mode<synchronous>, transform_indices = @transform_1, window_bounds = array<i64: 128, 128>}, {pipeline_mode = #tpu.pipeline_mode<synchronous>, transform_indices = @transform_2, window_bounds = array<i64: 1, 128>}, {pipeline_mode = #tpu.pipeline_mode<synchronous>, transform_indices = @transform_3, window_bounds = array<i64: 128, 128>}, {pipeline_mode = #tpu.pipeline_mode<synchronous>, transform_indices = @transform_4, window_bounds = array<i64: 1, 128>}, {pipeline_mode = #tpu.pipeline_mode<synchronous>, transform_indices = @transform_5, window_bounds = array<i64: 128, 128>}, {pipeline_mode = #tpu.pipeline_mode<synchronous>, transform_indices = @transform_6, window_bounds = array<i64: 1, 128>}, {transform_indices = @transform_7, window_bounds = array<i64: 8, 128>}]} {
    %c0 = arith.constant 0 : index
    %c0_0 = arith.constant 0 : index
    %0 = vector.load %arg1[%c0, %c0_0] : memref<8x128xbf16, #tpu.memory_space<vmem>>, vector<8x128xbf16>
    %c0_1 = arith.constant 0 : index
    %c0_2 = arith.constant 0 : index
    %1 = vector.load %arg2[%c0_1, %c0_2] : memref<128x128xbf16, #tpu.memory_space<vmem>>, vector<128x128xbf16>
    %cst = arith.constant dense<0.000000e+00> : vector<8x128xf32>
    %2 = tpu.matmul %0, %1, %cst {dimension_numbers = #tpu.dot_dimension_numbers<[1], [0], [0], [1], [0, 0, 1, 1], [], []>} : vector<8x128xbf16>, vector<128x128xbf16>, vector<8x128xf32> -> vector<8x128xf32>
    %c0_3 = arith.constant 0 : index
    %c0_4 = arith.constant 0 : index
    %3 = vector.load %arg3[%c0_3, %c0_4] : memref<1x128xf32, #tpu.memory_space<vmem>>, vector<1x128xf32>
    %4 = vector.broadcast %3 : vector<1x128xf32> to vector<8x128xf32>
    %5 = arith.addf %2, %4 : vector<8x128xf32>
    %cst_5 = arith.constant 0.000000e+00 : f32
    %6 = vector.broadcast %cst_5 : f32 to vector<8x128xf32>
    %7 = arith.maximumf %5, %6 : vector<8x128xf32>
    %8 = arith.truncf %7 : vector<8x128xf32> to vector<8x128xbf16>
    %c0_6 = arith.constant 0 : index
    %c0_7 = arith.constant 0 : index
    %9 = vector.load %arg4[%c0_6, %c0_7] : memref<128x128xbf16, #tpu.memory_space<vmem>>, vector<128x128xbf16>
    %cst_8 = arith.constant dense<0.000000e+00> : vector<8x128xf32>
    %10 = tpu.matmul %8, %9, %cst_8 {dimension_numbers = #tpu.dot_dimension_numbers<[1], [0], [0], [1], [0, 0, 1, 1], [], []>} : vector<8x128xbf16>, vector<128x128xbf16>, vector<8x128xf32> -> vector<8x128xf32>
    %c0_9 = arith.constant 0 : index
    %c0_10 = arith.constant 0 : index
    %11 = vector.load %arg5[%c0_9, %c0_10] : memref<1x128xf32, #tpu.memory_space<vmem>>, vector<1x128xf32>
    %12 = vector.broadcast %11 : vector<1x128xf32> to vector<8x128xf32>
    %13 = arith.addf %10, %12 : vector<8x128xf32>
    %cst_11 = arith.constant 0.000000e+00 : f32
    %14 = vector.broadcast %cst_11 : f32 to vector<8x128xf32>
    %15 = arith.maximumf %13, %14 : vector<8x128xf32>
    %16 = arith.truncf %15 : vector<8x128xf32> to vector<8x128xbf16>
    %c0_12 = arith.constant 0 : index
    %c0_13 = arith.constant 0 : index
    %17 = vector.load %arg6[%c0_12, %c0_13] : memref<128x128xbf16, #tpu.memory_space<vmem>>, vector<128x128xbf16>
    %cst_14 = arith.constant dense<0.000000e+00> : vector<8x128xf32>
    %18 = tpu.matmul %16, %17, %cst_14 {dimension_numbers = #tpu.dot_dimension_numbers<[1], [0], [0], [1], [0, 0, 1, 1], [], []>} : vector<8x128xbf16>, vector<128x128xbf16>, vector<8x128xf32> -> vector<8x128xf32>
    %c0_15 = arith.constant 0 : index
    %c0_16 = arith.constant 0 : index
    %19 = vector.load %arg7[%c0_15, %c0_16] : memref<1x128xf32, #tpu.memory_space<vmem>>, vector<1x128xf32>
    %20 = vector.broadcast %19 : vector<1x128xf32> to vector<8x128xf32>
    %21 = arith.addf %18, %20 : vector<8x128xf32>
    %22 = tpu.iota {dimensions = array<i32: 1>} : vector<8x128xi32>
    %c64_i32 = arith.constant 64 : i32
    %23 = vector.broadcast %c64_i32 : i32 to vector<8x128xi32>
    %24 = arith.cmpi sge, %22, %23 : vector<8x128xi32>
    %cst_17 = arith.constant 0.000000e+00 : f32
    %25 = vector.broadcast %cst_17 : f32 to vector<8x128xf32>
    %26 = arith.maximumf %21, %25 : vector<8x128xf32>
    %27 = arith.select %24, %26, %21 : vector<8x128xi1>, vector<8x128xf32>
    %c0_18 = arith.constant 0 : index
    %c0_19 = arith.constant 0 : index
    %28 = vector.load %arg8[%c0_18, %c0_19] : memref<8x128xf32, #tpu.memory_space<vmem>>, vector<8x128xf32>
    tpu.vector_store %arg8[%c0_18, %c0_19], %27 {strides = array<i32>} : memref<8x128xf32, #tpu.memory_space<vmem>>, vector<8x128xf32>,
    return
  }
  func.func @transform_0(%arg0: i32) -> (i32, i32) {
    %c0_i32 = arith.constant 0 : i32
    %c0_i32_0 = arith.constant 0 : i32
    return %arg0, %c0_i32 : i32, i32
  }
  func.func @transform_1(%arg0: i32) -> (i32, i32) {
    %c0_i32 = arith.constant 0 : i32
    %c0_i32_0 = arith.constant 0 : i32
    %c0_i32_1 = arith.constant 0 : i32
    return %c0_i32, %c0_i32_0 : i32, i32
  }
  func.func @transform_2(%arg0: i32) -> (i32, i32) {
    %c0_i32 = arith.constant 0 : i32
    %c0_i32_0 = arith.constant 0 : i32
    %c0_i32_1 = arith.constant 0 : i32
    return %c0_i32, %c0_i32_0 : i32, i32
  }
  func.func @transform_3(%arg0: i32) -> (i32, i32) {
    %c0_i32 = arith.constant 0 : i32
    %c0_i32_0 = arith.constant 0 : i32
    %c0_i32_1 = arith.constant 0 : i32
    return %c0_i32, %c0_i32_0 : i32, i32
  }
  func.func @transform_4(%arg0: i32) -> (i32, i32) {
    %c0_i32 = arith.constant 0 : i32
    %c0_i32_0 = arith.constant 0 : i32
    %c0_i32_1 = arith.constant 0 : i32
    return %c0_i32, %c0_i32_0 : i32, i32
  }
  func.func @transform_5(%arg0: i32) -> (i32, i32) {
    %c0_i32 = arith.constant 0 : i32
    %c0_i32_0 = arith.constant 0 : i32
    %c0_i32_1 = arith.constant 0 : i32
    return %c0_i32, %c0_i32_0 : i32, i32
  }
  func.func @transform_6(%arg0: i32) -> (i32, i32) {
    %c0_i32 = arith.constant 0 : i32
    %c0_i32_0 = arith.constant 0 : i32
    %c0_i32_1 = arith.constant 0 : i32
    return %c0_i32, %c0_i32_0 : i32, i32
  }
  func.func @transform_7(%arg0: i32) -> (i32, i32) {
    %c0_i32 = arith.constant 0 : i32
    %c0_i32_0 = arith.constant 0 : i32
    return %arg0, %c0_i32 : i32, i32
  }
}

</mosaic_0001>

<bundles_post_ra>
// kernel: tpu_custom_call.1
= control target key start
LH: loop header
LB: loop body
LE: loop exit
PB: predicated region body
PF: predicated region fallthrough
CT: control target
= control target key end

     0   :  { %12 = vsyncpa [#allocation3], 0  ;;  %s690_s0 = inlined_call_operand.hbm [shape: bf16[8,128], index: 0, kind: input, shape index: {}]   ;;  %s691_s1 = inlined_call_operand.hbm [shape: bf16[128,128], index: 1, kind: input, shape index: {}]   ;;  %s692_s2 = inlined_call_operand.vmem [shape: f32[1,128], index: 2, kind: input, shape index: {}]   ;;  %s693_s3 = inlined_call_operand.hbm [shape: bf16[128,128], index: 3, kind: input, shape index: {}]   ;;  %s694_s4 = inlined_call_operand.vmem [shape: f32[1,128], index: 4, kind: input, shape index: {}]   ;;  %s695_s5 = inlined_call_operand.hbm [shape: bf16[128,128], index: 5, kind: input, shape index: {}]   ;;  %s696_s6 = inlined_call_operand.vmem [shape: f32[1,128], index: 6, kind: input, shape index: {}]   ;;  %s697_s7 = inlined_call_operand.hbm [shape: f32[8,128], index: 7, kind: output, shape index: {}]  }
   0x1   :  { %13 = vsyncpa [#allocation6], 0 }
   0x2   :  { %14 = vsyncpa [#allocation9], 0  ;;  %s31_s26 = sshll.u32 %s691_s1, 4  ;;  %s32_s26 = int_to_ptr.hbm [resolvable:$true] %s31_s26 }
   0x3   :  { %15 = vsyncpa [#allocation4], 0  ;;  %s619_s27 = smov [#allocation5]   ;;  %s21_s8 = sshll.u32 %s690_s0, 4  ;;  %s22_s8 = int_to_ptr.hbm [resolvable:$true] %s21_s8 }
   0x4   :  { %s33_s28 = sshll.u32 %s619_s27, 4  ;;  %s620_s9 = smov 64   ;;  %s34_s28 = int_to_ptr.vmem [resolvable:$true] %s33_s28 }
   0x5   :  { %s621_s10 = smov 4   ;;  %s622_s11 = smov [#allocation2]  }
   0x6   :  { %39 = dma.hbm_to_vmem [thread:$0]  %s32_s26, 1024, %s34_s28, [#allocation6], %s620_s9, %s620_s9, %s621_s10  }
   0x7   :  { %s23_s12 = sshll.u32 %s622_s11, 4  ;;  %s46_s15 = sshll.u32 %s693_s3, 4  ;;  %s24_s12 = int_to_ptr.vmem [resolvable:$true] %s23_s12  ;;  %s47_s15 = int_to_ptr.hbm [resolvable:$true] %s46_s15 }
   0x8   :  { %26 = dma.hbm_to_vmem [thread:$0]  %s22_s8, 64, %s24_s12, [#allocation3]  }
   0x9   :  { %s61_s17 = sshll.u32 %s695_s5, 4  ;;  %s623_s18 = smov [#allocation7]   ;;  %s62_s17 = int_to_ptr.hbm [resolvable:$true] %s61_s17 }
   0xa   :  { %s48_s19 = sshll.u32 %s623_s18, 4  ;;  %s624_s0 = smov [#allocation8]   ;;  %s49_s19 = int_to_ptr.vmem [resolvable:$true] %s48_s19 }
   0xb   :  { %54 = dma.hbm_to_vmem [thread:$0]  %s47_s15, 1024, %s49_s19, [#allocation6], %s620_s9, %s620_s9, %s621_s10  }
   0xc   :  { %s63_s20 = sshll.u32 %s624_s0, 4  ;;  %s64_s20 = int_to_ptr.vmem [resolvable:$true] %s63_s20 }
   0xd   :  { %69 = dma.hbm_to_vmem [thread:$0]  %s62_s17, 1024, %s64_s20, [#allocation9], %s620_s9, %s620_s9, %s621_s10  }
   0xe   :  { %611 = dma.done.wait [#allocation3], 64  }
   0xf   :  { %612 = vsyncadd [#allocation3], 4294967232 }
  0x10   :  { %613 = dma.done.wait [#allocation6], 2048  }
  0x11   :  { %614 = vsyncadd [#allocation6], 4294965248 }
  0x12   :  { %615 = dma.done.wait [#allocation9], 1024  }
  0x13   :  { %616 = vsyncadd [#allocation9], 4294966272  ;;  %v464_v0 = vld [vmem:[#allocation5 + $0x38] sm:$0xff]  ;;  %v463_v1 = vld [vmem:[#allocation5 + $0x30] sm:$0xff]  ;;  %v336_v37 = vlaneseq  ;;  %s625_s24 = smov [#allocation10]  }
  0x14   :  { %157 = vmatpush.bf16.msra.mxu0 %v464_v0  ;;  %v472_v2 = vld [vmem:[#allocation7 + $0x38] sm:$0xff]  ;;  %v471_v3 = vld [vmem:[#allocation7 + $0x30] sm:$0xff]  ;;  %v462_v4 = vld [vmem:[#allocation5 + $0x28] sm:$0xff]  ;;  %s347_s25 = sshll.u32 %s625_s24, 4  ;;  %s348_s25 = int_to_ptr.vmem [resolvable:$true] %s347_s25 }
  0x15   :  { %240 = vmatpush.bf16.msra.mxu1 %v472_v2  ;;  %v470_v5 = vld [vmem:[#allocation7 + $0x28] sm:$0xff]  ;;  %v461_v6 = vld [vmem:[#allocation5 + $0x20] sm:$0xff]  ;;  %v460_v8 = vld [vmem:[#allocation5 + $0x18] sm:$0xff]  ;;  %v337_v39 = vand.u32 127, %v336_v37 }
  0x16   :  { %v469_v7 = vld [vmem:[#allocation7 + $0x20] sm:$0xff]  ;;  %v468_v9 = vld [vmem:[#allocation7 + $0x18] sm:$0xff]  ;;  %v459_v10 = vld [vmem:[#allocation5 + $0x10] sm:$0xff] }
  0x17   :  { %v467_v11 = vld [vmem:[#allocation7 + $0x10] sm:$0xff]  ;;  %v458_v12 = vld [vmem:[#allocation5 + $0x8] sm:$0xff]  ;;  %v457_v13 = vld [vmem:[#allocation5] sm:$0xff]  ;;  %vm338_vm0 = vcmp.ge.s32.totalorder %v337_v39, 64 }
  0x18   :  { %158 = vmatpush.bf16.msra.mxu0 %v463_v1  ;;  %v88_v14 = vld [vmem:[#allocation2] sm:$0xf]  ;;  %v466_v15 = vld [vmem:[#allocation7 + $0x8] sm:$0xff]  ;;  %v465_v16 = vld [vmem:[#allocation7] sm:$0xff] }
  0x19   :  { %241 = vmatpush.bf16.msra.mxu1 %v471_v3  ;;  %v480_v17 = vld [vmem:[#allocation8 + $0x38] sm:$0xff]  ;;  %v479_v18 = vld [vmem:[#allocation8 + $0x30] sm:$0xff]  ;;  %v478_v19 = vld [vmem:[#allocation8 + $0x28] sm:$0xff] }
  0x1a   :  { %323 = vmatpush.bf16.msra.mxu2 %v480_v17  ;;  %v477_v20 = vld [vmem:[#allocation8 + $0x20] sm:$0xff]  ;;  %v476_v21 = vld [vmem:[#allocation8 + $0x18] sm:$0xff]  ;;  %v475_v22 = vld [vmem:[#allocation8 + $0x10] sm:$0xff] }
  0x1b   :  { %v488_v23 = vld [vmem:[%s692_s2] ss:$0 sm:$0xff]  ;;  %v474_v29 = vld [vmem:[#allocation8 + $0x8] sm:$0xff]  ;;  %v473_v30 = vld [vmem:[#allocation8] sm:$0xff] }
  0x1c   :  { %159 = vmatpush.bf16.msra.mxu0 %v462_v4  ;;  %v489_v31 = vld [vmem:[%s694_s4] ss:$0 sm:$0xff]  ;;  %s349_s4 = sshll.u32 %s697_s7, 4  ;;  %s350_s4 = int_to_ptr.hbm [resolvable:$true] %s349_s4 }
  0x1d   :  { %242 = vmatpush.bf16.msra.mxu1 %v470_v5  ;;  %v490_v38 = vld [vmem:[%s696_s6] ss:$0 sm:$0xff] }
  0x1e   :  { %324 = vmatpush.bf16.msra.mxu2 %v479_v18 }
  0x20   :  { %160 = vmatpush.bf16.msra.mxu0 %v461_v6 }
  0x21   :  { %243 = vmatpush.bf16.msra.mxu1 %v469_v7 }
  0x22   :  { %325 = vmatpush.bf16.msra.mxu2 %v478_v19 }
  0x24   :  { %161 = vmatpush.bf16.msra.mxu0 %v460_v8 }
  0x25   :  { %244 = vmatpush.bf16.msra.mxu1 %v468_v9 }
  0x26   :  { %326 = vmatpush.bf16.msra.mxu2 %v477_v20 }
  0x28   :  { %162 = vmatpush.bf16.msra.mxu0 %v459_v10 }
  0x29   :  { %245 = vmatpush.bf16.msra.mxu1 %v467_v11 }
  0x2a   :  { %327 = vmatpush.bf16.msra.mxu2 %v476_v21 }
  0x2c   :  { %163 = vmatpush.bf16.msra.mxu0 %v458_v12 }
  0x2d   :  { %246 = vmatpush.bf16.msra.mxu1 %v466_v15 }
  0x2e   :  { %328 = vmatpush.bf16.msra.mxu2 %v475_v22 }
  0x30   :  { %164 = vmatpush.bf16.msra.mxu0 %v457_v13 }
  0x31   :  { %247 = vmatpush.bf16.msra.mxu1 %v465_v16 }
  0x32   :  { %329 = vmatpush.bf16.msra.mxu2 %v474_v29 }
  0x33   :  { %165 = vmatmul.bf16.vlgmr.msra.gmra.mxu0 %v88_v14 }
  0x36   :  { %330 = vmatpush.bf16.msra.mxu2 %v473_v30 }
  0xb0   :  { %v166_v24 = vpop.f32.mrf.mxu0 }
  0xb1   :  { %v167_v25 = vadd.f32 %v488_v23, %v166_v24 }
  0xb3   :  { %v170_v26 = vmax.f32 %v167_v25, 0.0 }
  0xb5   :  { %v171_v27 = vpack.c.bf16 %v170_v26, %v170_v26 }
  0xb7   :  { %248 = vmatmul.bf16.vlgmr.msra.gmra.mxu1 %v171_v27 }
  0xb8   :  { %v168_v28 = vpop.f32.mrf.mxu0 }
 0x134   :  { %v249_v32 = vpop.f32.mrf.mxu1 }
 0x135   :  { %v250_v33 = vadd.f32 %v489_v31, %v249_v32 }
 0x137   :  { %v253_v34 = vmax.f32 %v250_v33, 0.0 }
 0x139   :  { %v254_v35 = vpack.c.bf16 %v253_v34, %v253_v34 }
 0x13b   :  { %331 = vmatmul.bf16.vlgmr.msra.gmra.mxu2 %v254_v35 }
 0x13c   :  { %v251_v36 = vpop.f32.mrf.mxu1 }
 0x1be   :  { %v332_v40 = vpop.f32.mrf.mxu2 }
 0x1bf   :  { %v333_v41 = vadd.f32 %v490_v38, %v332_v40 }
 0x1c1   :  { %v339_v42 = vmax.f32 %v333_v41, 0.0 }
 0x1c3   :  { %v340_v43 = vsel %vm338_vm0, %v339_v42, %v333_v41 }
 0x1c4   :  { %341 = vst [vmem:[#allocation10] sm:$0xff] %v340_v43 }
 0x1c5   :  { %352 = dma.vmem_to_hbm [thread:$0]  %s348_s25, 128, %s350_s4, [#allocation4]  }
 0x1c6   :  { %v334_v44 = vpop.f32.mrf.mxu2 }
 0x1c7   :  { %617 = dma.done.wait [#allocation4], 128  }
 0x1c8   :  { %618 = vsyncadd [#allocation4], 4294967168 }
 0x1c9   :  { %357 = vsyncpa [#allocation3], 1 }
 0x1ca   :  { %358 = vsyncpa [#allocation6], 1 }
 0x1cb   :  { %359 = vsyncpa [#allocation9], 1 }
 0x1cc   :  { %360 = vsyncpa [#allocation4], 1 }

</bundles_post_ra>
